<compile_context>
chip_gen: v7x
topology: tpu7x:2x2x1
jax: 0.10.0
libtpu: 0.0.40
codegen_flags: <defaults>
</compile_context>

<pallas_src>
import functools

import jax
import jax.numpy as jnp
from jax.experimental import pallas as pl
from jax.experimental.pallas import tpu as pltpu

# Matches the torch module's eps in _cheb_interpolate_1d.  In float32 this is
# an effectively exact-zero test; kept to preserve the module's semantics.
EPS = 1e-14


# ----------------------------- kernel body ---------------------------------
def _rational2d_kernel(rw1_ref, inter_ref, out_ref):
    # One canonical MXU dot per output tile:
    #   (TM1, N1) @ (N1, TM2) -> (TM1, TM2)
    # Barycentric denominators are already folded into rw1 / inter by the
    # wrapper, so the lane-dense output tile comes straight off the MXU and is
    # stored unmasked (TM2 is a multiple of 128).
    out_ref[...] = jnp.dot(
        rw1_ref[...], inter_ref[...],
        preferred_element_type=jnp.float32).astype(out_ref.dtype)


# ----------------------------- wrapper helpers ------------------------------
def _round_up(x, m):
    return ((x + m - 1) // m) * m


def _cdiv(a, b):
    return (a + b - 1) // b


def _choose_tiles(m, target, align):
    """Pick tile COUNT first, then round the per-tile size to the layout grain.

    Keeps padded extent within `align-1` of m per tile instead of padding up to
    a full fixed tile (e.g. 300 -> 304 rather than 300 -> 512).
    """
    g = max(1, _cdiv(m, target))
    t = _round_up(_cdiv(m, g), align)
    return g, t


def _bary_ratio(xs_std, nodes_std, w):
    """Normalized barycentric ratio matrix, shape (m, N).

    result[i, j] = inv(i,j) * w[j] / sum_j inv(i,j) * w[j], with the module's
    exact-node branch: if |xs[i] - nodes[j]| < EPS for some j, the row becomes
    the indicator of that node (so the interpolant returns the nodal value).
    `result @ values_along_nodes` reproduces _cheb_interpolate_1d's num/den.
    """
    d = xs_std[:, None] - nodes_std[None, :]                  # (m, N)
    small = (jnp.abs(d) < EPS).astype(jnp.float32)
    hit = jnp.any(jnp.abs(d) < EPS, axis=1, keepdims=True)    # (m, 1)
    inv = jnp.where(hit, small, 1.0 / d)                      # (m, N)
    rw = inv * w[None, :]
    return rw / jnp.sum(rw, axis=1, keepdims=True)


# ----------------------------- wrapper ---------------------------------------
@functools.partial(jax.jit,
                   static_argnames=("domain_1", "domain_2", "out_dtype"))
def rational_interpolation_2d(x1, x2, values, nodes1_std, w1, nodes2_std, w2,
                              domain_1, domain_2, out_dtype=jnp.float32):
    m1, m2 = x1.shape[0], x2.shape[0]
    N1, N2 = values.shape
    L1 = domain_1[1] - domain_1[0]
    L2 = domain_2[1] - domain_2[0]

    # _to_standard maps (glue, plain JAX).
    x1_std = 2.0 * (x1.astype(jnp.float32) - domain_1[0]) / L1 - 1.0
    x2_std = 2.0 * (x2.astype(jnp.float32) - domain_2[0]) / L2 - 1.0

    # --- Tiling: tile count first, then per-tile size rounded to (8, 128).
    g1, TM1 = _choose_tiles(m1, 512, 8)       # m1 -> sublanes
    g2, TM2 = _choose_tiles(m2, 2048, 128)    # m2 -> lanes (store-dense)
    # v7x megacore: give the second TensorCore work when the natural tiling is
    # a single tile (no-op on v5e/v6e, ~2x on v7x for 1-tile grids).
    if g1 == 1 and g2 == 1:
        if m1 >= 16:
            g1, TM1 = 2, _round_up(_cdiv(m1, 2), 8)
        elif m2 >= 256:
            g2, TM2 = 2, _round_up(_cdiv(m2, 2), 128)
    m1p, m2p = g1 * TM1, g2 * TM2

    # Pad eval points with a standard-domain value outside [-1, 1] (never hits
    # a node); padded rows/columns are sliced away after the kernel.
    x1p = jnp.full((m1p,), 2.0, jnp.float32).at[:m1].set(x1_std)
    x2p = jnp.full((m2p,), 2.0, jnp.float32).at[:m2].set(x2_std)

    # --- Hoisted barycentric prologues: O((m1+m2)*N) work done once by XLA,
    # removing the lane-sparse VPU prologue (and its vreg pressure) from the
    # per-tile body.
    rw1 = _bary_ratio(x1p, nodes1_std.astype(jnp.float32),
                      w1.astype(jnp.float32))                  # (m1p, N1)
    rw2 = _bary_ratio(x2p, nodes2_std.astype(jnp.float32),
                      w2.astype(jnp.float32))                  # (m2p, N2)
    # Stage 1: rational interpolation of every 1-D interpolant along dim 2.
    inter = jnp.dot(values.astype(jnp.float32), rw2.T,
                    preferred_element_type=jnp.float32)        # (N1, m2p)

    out = pl.pallas_call(
        _rational2d_kernel,
        out_shape=jax.ShapeDtypeStruct((m1p, m2p), out_dtype),
        grid=(g1, g2),
        in_specs=[
            pl.BlockSpec((TM1, N1), lambda i, j: (i, 0)),   # rw1 tile
            pl.BlockSpec((N1, TM2), lambda i, j: (0, j)),   # stage-1 values
        ],
        out_specs=pl.BlockSpec((TM1, TM2), lambda i, j: (i, j)),
        compiler_params=pltpu.CompilerParams(
            dimension_semantics=("parallel", "parallel")),
    )(rw1, inter)

    return out[:m1, :m2]


# ----------------------------- setup / reference ----------------------------
def cheb_nodes_standard(N):
    i = jnp.linspace(0.0, 1.0, N)
    return jnp.cos(jnp.pi * i)


def barycentric_weights(nodes):
    # compute_barycentric_weights_vect: w_j = 1 / prod_{k != j} (x_j - x_k)
    N = nodes.shape[0]
    diff = nodes[:, None] - nodes[None, :] + jnp.eye(N, dtype=nodes.dtype)
    return 1.0 / jnp.prod(diff, axis=1)


def _reference(x1, x2, values, n1, w1, n2, w2, domain_1, domain_2):
    """Pure-JAX mirror of the torch module's barycentric math (f32, no MXU)."""
    x1s = 2.0 * (x1 - domain_1[0]) / (domain_1[1] - domain_1[0]) - 1.0
    x2s = 2.0 * (x2 - domain_2[0]) / (domain_2[1] - domain_2[0]) - 1.0

    def bary(xs, nodes, w, vals):                 # vals (K, N) -> (m, K)
        d = xs[:, None, None] - nodes[None, None, :]            # (m, 1, N)
        small = (jnp.abs(d) < EPS).astype(jnp.float32)
        hit = jnp.max(small, axis=-1, keepdims=True) > 0.0
        inv = jnp.where(hit, small, 1.0 / d)                    # (m, 1, N)
        num = jnp.sum(vals[None, :, :] * inv * w[None, None, :], axis=-1)
        den = jnp.sum(inv * w[None, None, :], axis=-1)          # (m, 1)
        return num / den

    inter_t = bary(x2s, n2, w2, values)           # (m2, N1)
    return bary(x1s, n1, w1, inter_t)             # (m1, m2)


# ----------------------------- main ------------------------------------------
if __name__ == "__main__":
    N_1, N_2 = 8, 8          # module grid sizes
    m1, m2 = 300, 200        # eval points (exercises padding + 2-tile grid)
    domain_1 = (-1.0, 1.0)
    domain_2 = (0.0, 2.0)

    key = jax.random.PRNGKey(0)
    k_vals, k_x1, k_x2 = jax.random.split(key, 3)
    # Nodal values of the interpolant (N_1, N_2), as installed via set_values().
    values = jax.random.normal(k_vals, (N_1, N_2), dtype=jnp.float32)

    # Chebyshev nodes (standard domain) and barycentric weights, both dims.
    nodes1_std = cheb_nodes_standard(N_1).astype(jnp.float32)
    nodes2_std = cheb_nodes_standard(N_2).astype(jnp.float32)
    w1 = barycentric_weights(nodes1_std)
    w2 = barycentric_weights(nodes2_std)

    # Evaluation points inside the physical domains.
    x1 = jax.random.uniform(k_x1, (m1,), jnp.float32,
                            minval=domain_1[0], maxval=domain_1[1])
    x2 = jax.random.uniform(k_x2, (m2,), jnp.float32,
                            minval=domain_2[0], maxval=domain_2[1])
    # Exercise the exact-node (small_diff) branch on both dimensions.
    node1_phys = domain_1[0] + (nodes1_std[0] + 1.0) * (domain_1[1] - domain_1[0]) / 2.0
    node2_phys = domain_2[0] + (nodes2_std[0] + 1.0) * (domain_2[1] - domain_2[0]) / 2.0
    x1 = x1.at[0].set(node1_phys)
    x2 = x2.at[0].set(node2_phys)

    out = rational_interpolation_2d(x1, x2, values, nodes1_std, w1,
                                    nodes2_std, w2, domain_1, domain_2)
    out = jax.block_until_ready(out)

    ref = _reference(x1, x2, values, nodes1_std, w1, nodes2_std, w2,
                     domain_1, domain_2)
    assert out.shape == (m1, m2)
    assert jnp.allclose(out, ref, atol=2e-5, rtol=2e-5), float(
        jnp.max(jnp.abs(out - ref)))

    print("KERNEL_OK")
</pallas_src>

<mosaic_0001>
module attributes {stable_mosaic.version = 11 : i64} {
  func.func @_rational2d_kernel(%arg0: i32, %arg1: i32, %arg2: memref<152x8xf32, #tpu.memory_space<vmem>>, %arg3: memref<8x256xf32, #tpu.memory_space<vmem>>, %arg4: memref<152x256xf32, #tpu.memory_space<vmem>>) attributes {dimension_semantics = [#tpu.dimension_semantics<parallel>, #tpu.dimension_semantics<parallel>], iteration_bounds = array<i64: 2, 1>, scalar_prefetch = 0 : i64, scratch_operands = 0 : i64, tpu.core_type = #tpu.core_type<tc>, window_params = [{transform_indices = @transform_0, window_bounds = array<i64: 152, 8>}, {transform_indices = @transform_1, window_bounds = array<i64: 8, 256>}, {transform_indices = @transform_2, window_bounds = array<i64: 152, 256>}]} {
    %c0 = arith.constant 0 : index
    %c0_0 = arith.constant 0 : index
    %0 = vector.load %arg2[%c0, %c0_0] : memref<152x8xf32, #tpu.memory_space<vmem>>, vector<152x8xf32>
    %c0_1 = arith.constant 0 : index
    %c0_2 = arith.constant 0 : index
    %1 = vector.load %arg3[%c0_1, %c0_2] : memref<8x256xf32, #tpu.memory_space<vmem>>, vector<8x256xf32>
    %cst = arith.constant dense<0.000000e+00> : vector<152x256xf32>
    %2 = tpu.matmul %0, %1, %cst {dimension_numbers = #tpu.dot_dimension_numbers<[1], [0], [0], [1], [0, 0, 1, 1], [], []>} : vector<152x8xf32>, vector<8x256xf32>, vector<152x256xf32> -> vector<152x256xf32>
    %c0_3 = arith.constant 0 : index
    %c0_4 = arith.constant 0 : index
    %3 = vector.load %arg4[%c0_3, %c0_4] : memref<152x256xf32, #tpu.memory_space<vmem>>, vector<152x256xf32>
    tpu.vector_store %arg4[%c0_3, %c0_4], %2 {strides = array<i32>} : memref<152x256xf32, #tpu.memory_space<vmem>>, vector<152x256xf32>,
    return
  }
  func.func @transform_0(%arg0: i32, %arg1: i32) -> (i32, i32) {
    %c0_i32 = arith.constant 0 : i32
    %c0_i32_0 = arith.constant 0 : i32
    return %arg0, %c0_i32 : i32, i32
  }
  func.func @transform_1(%arg0: i32, %arg1: i32) -> (i32, i32) {
    %c0_i32 = arith.constant 0 : i32
    %c0_i32_0 = arith.constant 0 : i32
    return %c0_i32, %arg1 : i32, i32
  }
  func.func @transform_2(%arg0: i32, %arg1: i32) -> (i32, i32) {
    %c0_i32 = arith.constant 0 : i32
    return %arg0, %arg1 : i32, i32
  }
}

</mosaic_0001>

<bundles_post_ra>
// kernel: rational_interpolation_2d.1
= control target key start
LH: loop header
LB: loop body
LE: loop exit
PB: predicated region body
PF: predicated region fallthrough
CT: control target
= control target key end

     0   :  { %s687_s9 = smov 0   ;;  %s689_s10 = smov 0   ;;  %s829_s0 = inlined_call_operand.vmem [shape: f32[304,8], index: 0, kind: input, shape index: {}]   ;;  %s830_s1 = inlined_call_operand.vmem [shape: f32[8,256], index: 1, kind: input, shape index: {}]   ;;  %s831_s2 = inlined_call_operand.vmem [shape: f32[304,256], index: 2, kind: output, shape index: {}]  }
   0x1   :  { %s691_s11 = smov 0  }
   0x2 LB: > { %s24_s12 = sadd.s32 1, %s665_s10  ;;  %p594_p0 = scmp.ge.s32.totalorder %s669_s11, 1  ;;  %s669_s11 = sphi %s691_s11, %s12_s11   ;;  %s665_s10 = sphi %s689_s10, %s833_s10   ;;  %s661_s9 = sphi %s687_s9, %s832_s9  }
   0x3   : > { %p26_p1 = scmp.ge.s32.totalorder %s24_s12, 2  ;;  %p138_p2 = scmp.lt.s32.totalorder %s669_s11, 3 }
   0x5   : > { %s835_s12 = smov (%p26_p1, %s24_s12), 0  ;;  %p139_p3 = pnand %p594_p0, %p138_p2 }
   0x6   : > { %v214_v0 = vld [vmem:[%s830_s1 + $0x8] sm:$0xff] (!%p139_p3)  ;;  %v213_v1 = vld [vmem:[%s830_s1] sm:$0xff] (!%p139_p3)  ;;  %s170_s17 = smul.u32 (!%p139_p3), 19, %s661_s9  ;;  %v671_v2 = vmov (!%p139_p3), 0.0   ;;  %vm215_vm0 = vcmask (!%p139_p3), 64512  }
   0x7   : > { %142 = sbr.rel (%p139_p3) target bundleno = 268 (0x10c), region = 28  ;;  %273 = vmatprep.subr.mxu0 (!%p139_p3), %v214_v0  ;;  %337 = vmatprep.mubr.f32.mxu0 (!%p139_p3), %v671_v2 }
   0x8   : > { %274 = vmatpush1.msra.mxu0 (!%p139_p3), %v213_v1  ;;  %p171_p4 = scmp.lt.s32.totalorder (!%p139_p3), %s170_s17, 37  ;;  %620 = vmatprep.subr.mxu1 (!%p139_p3), %v214_v0 }
   0x9   : > { %621 = vmatpush1.msra.mxu1 (!%p139_p3), %v213_v1  ;;  %397 = vmatprep.mubr.f32.mxu1 (!%p139_p3), %v671_v2 }
   0xe   : > { %s837_s17 = smov (!%p171_p4, %s170_s17), 37 }
   0xf   : > { %s595_s18 = sshll.u32 %s837_s17, 3  ;;  %s619_s22 = sshll.u32 %s837_s17, 4 }
  0x10   : > { %s719_s21 = scalar_lea.vmem %s829_s0, %s595_s18  ;;  %s780_s25 = scalar_lea.vmem %s831_s2, %s619_s22 }
  0x11   : > { %v194_v3 = vld [vmem:[%s719_s21] sm:$0xff]  ;;  %v204_v4 = vld [vmem:[%s719_s21 + $0x50] sm:$0xff]  ;;  %v195_v5 = vld [vmem:[%s719_s21 + $0x8] sm:$0xff] }
  0x12   : > { %598 = vmatmul.mubr.msk.f32.vlgmr.msra.gmra.mrb[0].mxu0 %vm215_vm0, %v194_v3  ;;  %608 = vmatmul.mubr.msk.f32.vlgmr.msra.gmra.mrb[0].mxu1 %vm215_vm0, %v204_v4  ;;  %v205_v6 = vld [vmem:[%s719_s21 + $0x58] sm:$0xff]  ;;  %v196_v7 = vld [vmem:[%s719_s21 + $0x10] sm:$0xff]  ;;  %v206_v8 = vld [vmem:[%s719_s21 + $0x60] sm:$0xff] }
  0x13   : > { %343 = vmatprep.mubr.f32.mxu0 %v671_v2  ;;  %403 = vmatprep.mubr.f32.mxu1 %v671_v2  ;;  %v197_v9 = vld [vmem:[%s719_s21 + $0x18] sm:$0xff]  ;;  %v207_v10 = vld [vmem:[%s719_s21 + $0x68] sm:$0xff]  ;;  %v198_v11 = vld [vmem:[%s719_s21 + $0x20] sm:$0xff] }
  0x14   : > { %v208_v12 = vld [vmem:[%s719_s21 + $0x70] sm:$0xff]  ;;  %v199_v13 = vld [vmem:[%s719_s21 + $0x28] sm:$0xff]  ;;  %v209_v14 = vld [vmem:[%s719_s21 + $0x78] sm:$0xff] }
  0x15   : > { %v200_v15 = vld [vmem:[%s719_s21 + $0x30] sm:$0xff]  ;;  %v210_v16 = vld [vmem:[%s719_s21 + $0x80] sm:$0xff]  ;;  %v201_v17 = vld [vmem:[%s719_s21 + $0x38] sm:$0xff] }
  0x16   : > { %599 = vmatmul.mubr.msk.f32.gmra.mrb[2].mxu0 %vm215_vm0, %v195_v5  ;;  %609 = vmatmul.mubr.msk.f32.gmra.mrb[2].mxu1 %vm215_vm0, %v205_v6  ;;  %v211_v18 = vld [vmem:[%s719_s21 + $0x88] sm:$0xff]  ;;  %v202_v19 = vld [vmem:[%s719_s21 + $0x40] sm:$0xff]  ;;  %v212_v20 = vld [vmem:[%s719_s21 + $0x90] sm:$0xff] }
  0x17   : > { %349 = vmatprep.mubr.f32.mxu0 %v671_v2  ;;  %409 = vmatprep.mubr.f32.mxu1 %v671_v2  ;;  %v203_v21 = vld [vmem:[%s719_s21 + $0x48] sm:$0xff] }
  0x1a   : > { %600 = vmatmul.mubr.msk.f32.gmra.mrb[4].mxu0 %vm215_vm0, %v196_v7  ;;  %610 = vmatmul.mubr.msk.f32.gmra.mrb[4].mxu1 %vm215_vm0, %v206_v8 }
  0x1b   : > { %355 = vmatprep.mubr.f32.mxu0 %v671_v2  ;;  %415 = vmatprep.mubr.f32.mxu1 %v671_v2 }
  0x1e   : > { %601 = vmatmul.mubr.msk.f32.gmra.mrb[6].mxu0 %vm215_vm0, %v197_v9  ;;  %611 = vmatmul.mubr.msk.f32.gmra.mrb[6].mxu1 %vm215_vm0, %v207_v10 }
  0x1f   : > { %361 = vmatprep.mubr.f32.mxu0 %v671_v2  ;;  %421 = vmatprep.mubr.f32.mxu1 %v671_v2 }
  0x22   : > { %602 = vmatmul.mubr.msk.f32.gmra.mrb[8].mxu0 %vm215_vm0, %v198_v11  ;;  %612 = vmatmul.mubr.msk.f32.gmra.mrb[8].mxu1 %vm215_vm0, %v208_v12 }
  0x23   : > { %367 = vmatprep.mubr.f32.mxu0 %v671_v2  ;;  %427 = vmatprep.mubr.f32.mxu1 %v671_v2 }
  0x26   : > { %603 = vmatmul.mubr.msk.f32.gmra.mrb[10].mxu0 %vm215_vm0, %v199_v13  ;;  %613 = vmatmul.mubr.msk.f32.gmra.mrb[10].mxu1 %vm215_vm0, %v209_v14 }
  0x27   : > { %373 = vmatprep.mubr.f32.mxu0 %v671_v2  ;;  %433 = vmatprep.mubr.f32.mxu1 %v671_v2 }
  0x2a   : > { %604 = vmatmul.mubr.msk.f32.gmra.mrb[12].mxu0 %vm215_vm0, %v200_v15  ;;  %614 = vmatmul.mubr.msk.f32.gmra.mrb[12].mxu1 %vm215_vm0, %v210_v16 }
  0x2b   : > { %379 = vmatprep.mubr.f32.mxu0 %v671_v2  ;;  %439 = vmatprep.mubr.f32.mxu1 %v671_v2 }
  0x2e   : > { %605 = vmatmul.mubr.msk.f32.gmra.mrb[14].mxu0 %vm215_vm0, %v201_v17  ;;  %615 = vmatmul.mubr.msk.f32.gmra.mrb[14].mxu1 %vm215_vm0, %v211_v18 }
  0x2f   : > { %385 = vmatprep.mubr.f32.mxu0 %v671_v2  ;;  %445 = vmatprep.mubr.f32.mxu1 %v671_v2 }
  0x32   : > { %606 = vmatmul.mubr.msk.f32.gmra.mrb[16].mxu0 %vm215_vm0, %v202_v19  ;;  %616 = vmatmul.mubr.msk.f32.gmra.mrb[16].mxu1 %vm215_vm0, %v212_v20 }
  0x33   : > { %391 = vmatprep.mubr.f32.mxu0 %v671_v2 }
  0x36   : > { %607 = vmatmul.mubr.msk.f32.gmra.mrb[18].mxu0 %vm215_vm0, %v203_v21 }
  0xe5   : > { %v339_v22 = vpop.f32.mrb[0].mxu0  ;;  %v399_v23 = vpop.f32.mrb[0].mxu1 }
  0xe6   : > { %452 = vst [vmem:[%s780_s25] sm:$0xff] %v339_v22  ;;  %v341_v24 = vpop.f32.mrb[1].mxu0  ;;  %472 = vst [vmem:[%s780_s25 + $0xa0] sm:$0xff] %v399_v23  ;;  %v401_v25 = vpop.f32.mrb[1].mxu1 }
  0xe7   : > { %453 = vst [vmem:[%s780_s25 + $0x8] sm:$0xff] %v341_v24  ;;  %473 = vst [vmem:[%s780_s25 + $0xa8] sm:$0xff] %v401_v25 }
  0xe9   : > { %v345_v26 = vpop.f32.mrb[2].mxu0  ;;  %v405_v27 = vpop.f32.mrb[2].mxu1 }
  0xea   : > { %454 = vst [vmem:[%s780_s25 + $0x10] sm:$0xff] %v345_v26  ;;  %v347_v28 = vpop.f32.mrb[3].mxu0  ;;  %474 = vst [vmem:[%s780_s25 + $0xb0] sm:$0xff] %v405_v27  ;;  %v407_v29 = vpop.f32.mrb[3].mxu1 }
  0xeb   : > { %455 = vst [vmem:[%s780_s25 + $0x18] sm:$0xff] %v347_v28  ;;  %475 = vst [vmem:[%s780_s25 + $0xb8] sm:$0xff] %v407_v29 }
  0xed   : > { %v351_v30 = vpop.f32.mrb[4].mxu0  ;;  %v411_v31 = vpop.f32.mrb[4].mxu1 }
  0xee   : > { %456 = vst [vmem:[%s780_s25 + $0x20] sm:$0xff] %v351_v30  ;;  %v353_v32 = vpop.f32.mrb[5].mxu0  ;;  %476 = vst [vmem:[%s780_s25 + $0xc0] sm:$0xff] %v411_v31  ;;  %v413_v33 = vpop.f32.mrb[5].mxu1 }
  0xef   : > { %457 = vst [vmem:[%s780_s25 + $0x28] sm:$0xff] %v353_v32  ;;  %477 = vst [vmem:[%s780_s25 + $0xc8] sm:$0xff] %v413_v33 }
  0xf1   : > { %v357_v34 = vpop.f32.mrb[6].mxu0  ;;  %v417_v35 = vpop.f32.mrb[6].mxu1 }
  0xf2   : > { %458 = vst [vmem:[%s780_s25 + $0x30] sm:$0xff] %v357_v34  ;;  %v359_v36 = vpop.f32.mrb[7].mxu0  ;;  %478 = vst [vmem:[%s780_s25 + $0xd0] sm:$0xff] %v417_v35  ;;  %v419_v37 = vpop.f32.mrb[7].mxu1 }
  0xf3   : > { %459 = vst [vmem:[%s780_s25 + $0x38] sm:$0xff] %v359_v36  ;;  %479 = vst [vmem:[%s780_s25 + $0xd8] sm:$0xff] %v419_v37 }
  0xf5   : > { %v363_v38 = vpop.f32.mrb[8].mxu0  ;;  %v423_v39 = vpop.f32.mrb[8].mxu1 }
  0xf6   : > { %460 = vst [vmem:[%s780_s25 + $0x40] sm:$0xff] %v363_v38  ;;  %v365_v40 = vpop.f32.mrb[9].mxu0  ;;  %480 = vst [vmem:[%s780_s25 + $0xe0] sm:$0xff] %v423_v39  ;;  %v425_v41 = vpop.f32.mrb[9].mxu1 }
  0xf7   : > { %461 = vst [vmem:[%s780_s25 + $0x48] sm:$0xff] %v365_v40  ;;  %481 = vst [vmem:[%s780_s25 + $0xe8] sm:$0xff] %v425_v41 }
  0xf9   : > { %v369_v42 = vpop.f32.mrb[10].mxu0  ;;  %v429_v43 = vpop.f32.mrb[10].mxu1 }
  0xfa   : > { %462 = vst [vmem:[%s780_s25 + $0x50] sm:$0xff] %v369_v42  ;;  %v371_v44 = vpop.f32.mrb[11].mxu0  ;;  %482 = vst [vmem:[%s780_s25 + $0xf0] sm:$0xff] %v429_v43  ;;  %v431_v45 = vpop.f32.mrb[11].mxu1 }
  0xfb   : > { %463 = vst [vmem:[%s780_s25 + $0x58] sm:$0xff] %v371_v44  ;;  %483 = vst [vmem:[%s780_s25 + $0xf8] sm:$0xff] %v431_v45 }
  0xfd   : > { %v375_v46 = vpop.f32.mrb[12].mxu0  ;;  %v435_v47 = vpop.f32.mrb[12].mxu1 }
  0xfe   : > { %464 = vst [vmem:[%s780_s25 + $0x60] sm:$0xff] %v375_v46  ;;  %v377_v48 = vpop.f32.mrb[13].mxu0  ;;  %484 = vst [vmem:[%s780_s25 + $0x100] sm:$0xff] %v435_v47  ;;  %v437_v49 = vpop.f32.mrb[13].mxu1 }
  0xff   : > { %465 = vst [vmem:[%s780_s25 + $0x68] sm:$0xff] %v377_v48  ;;  %485 = vst [vmem:[%s780_s25 + $0x108] sm:$0xff] %v437_v49 }
 0x101   : > { %v381_v50 = vpop.f32.mrb[14].mxu0  ;;  %v441_v51 = vpop.f32.mrb[14].mxu1 }
 0x102   : > { %466 = vst [vmem:[%s780_s25 + $0x70] sm:$0xff] %v381_v50  ;;  %v383_v52 = vpop.f32.mrb[15].mxu0  ;;  %486 = vst [vmem:[%s780_s25 + $0x110] sm:$0xff] %v441_v51  ;;  %v443_v53 = vpop.f32.mrb[15].mxu1 }
 0x103   : > { %467 = vst [vmem:[%s780_s25 + $0x78] sm:$0xff] %v383_v52  ;;  %487 = vst [vmem:[%s780_s25 + $0x118] sm:$0xff] %v443_v53 }
 0x105   : > { %v387_v54 = vpop.f32.mrb[16].mxu0  ;;  %v447_v55 = vpop.f32.mrb[16].mxu1 }
 0x106   : > { %468 = vst [vmem:[%s780_s25 + $0x80] sm:$0xff] %v387_v54  ;;  %v389_v56 = vpop.f32.mrb[17].mxu0  ;;  %488 = vst [vmem:[%s780_s25 + $0x120] sm:$0xff] %v447_v55  ;;  %v449_v57 = vpop.f32.mrb[17].mxu1 }
 0x107   : > { %469 = vst [vmem:[%s780_s25 + $0x88] sm:$0xff] %v389_v56  ;;  %489 = vst [vmem:[%s780_s25 + $0x128] sm:$0xff] %v449_v57 }
 0x109   : > { %v393_v58 = vpop.f32.mrb[18].mxu0 }
 0x10a   : > { %470 = vst [vmem:[%s780_s25 + $0x90] sm:$0xff] %v393_v58  ;;  %v395_v59 = vpop.f32.mrb[19].mxu0 }
 0x10b   : > { %471 = vst [vmem:[%s780_s25 + $0x98] sm:$0xff] %v395_v59 }
 0x10c PF: > { %s12_s11 = sadd.s32 1, %s669_s11   ;;  %s832_s9 = smov %s665_s10 }
 0x10d   : > { %p9_p5 = scmp.ge.s32.totalorder %s12_s11, 4   ;;  %s833_s10 = smov %s835_s12 }
 0x10f   :  { %11 = sbr.rel (!%p9_p5) target bundleno = 2 (0x2), region = 61 }

</bundles_post_ra>
